<compile_context>
chip_gen: v7x
topology: tpu7x:2x2x1
jax: 0.10.0
libtpu: 0.0.40
codegen_flags: <defaults>
</compile_context>

<pallas_src>
import functools
import math

import jax
import jax.numpy as jnp
from jax.experimental import pallas as pl
from jax.experimental.pallas import tpu as pltpu

ALPHA = 0.25
GAMMA = 2.0          # gamma == 2 -> |label - probs| ** 2 (computed as a square)
LANE = 128
SUBLANE = 8
ROW_ALIGN = 32       # block-row alignment valid for f32 (8), bf16 (16), int8 (32)


def _round_up(x, m):
    return -(-x // m) * m


def _focal_loss_kernel(logits_ref, label_ref, out_ref, *,
                       blocks_per_core, block_rows, num_row_blocks,
                       num_full_blocks, need_tail_mask, simple_path,
                       full_rows, col_rem):
    c = pl.program_id(0)            # partial-sum / core index ("parallel")
    i = pl.program_id(1)            # reduction step within a core ("arbitrary")
    b = c * blocks_per_core + i     # logical row-block index

    @pl.when(i == 0)
    def _():
        out_ref[...] = jnp.zeros_like(out_ref)

    x = logits_ref[...].astype(jnp.float32)
    y = label_ref[...].astype(jnp.float32)

    # Shared transcendental chain: e = exp(-|x|) drives both sigmoid(x) and the
    # numerically stable log-sigmoid terms (matches the torch softplus/where
    # construction exactly):
    #   log(sigmoid(x))     = min(x, 0)  - log1p(exp(-|x|))
    #   log(1 - sigmoid(x)) = min(-x, 0) - log1p(exp(-|x|))
    e = jnp.exp(-jnp.abs(x))
    d = 1.0 + e
    # EUP approx reciprocal + one Newton-Raphson step (~f32 accuracy) instead
    # of a multi-op VALU divide.
    inv = pl.reciprocal(d, approx=True)
    inv = inv * (2.0 - d * inv)
    probs = jnp.where(x >= 0.0, inv, e * inv)             # sigmoid(x)
    log1p_term = jnp.log1p(e)
    log_probs = jnp.minimum(x, 0.0) - log1p_term
    log_1_probs = jnp.minimum(-x, 0.0) - log1p_term

    diff = jnp.abs(y - probs)
    coeff = -(diff * diff)                                # gamma == 2

    loss = (y * ALPHA * log_probs
            + (1.0 - y) * (1.0 - ALPHA) * log_1_probs) * coeff

    def accumulate(v):
        # vreg-shaped partial-sum accumulation: pure VALU adds, no per-step
        # cross-lane XLU reduce and no serializing scalar RMW.
        out_ref[...] += v.reshape(block_rows // SUBLANE, SUBLANE, LANE).sum(axis=0)

    if simple_path:
        # Grid covers exactly the real row blocks and none contain padding.
        accumulate(loss)
    else:
        if num_full_blocks > 0:
            @pl.when(b < num_full_blocks)
            def _():
                accumulate(loss)

        if need_tail_mask:
            @pl.when(b == num_row_blocks - 1)
            def _():
                # Only the last real block can contain invalid elements
                # (partial edge rows read garbage; sub-128 tail was zero-padded).
                row0 = (num_row_blocks - 1) * block_rows
                row_ids = row0 + jax.lax.broadcasted_iota(jnp.int32, loss.shape, 0)
                col_ids = jax.lax.broadcasted_iota(jnp.int32, loss.shape, 1)
                # Row/column comparison (no flat-index multiply -> no int32
                # overflow for huge tensors).
                keep = (row_ids < full_rows) | (
                    (row_ids == full_rows) & (col_ids < col_rem))
                accumulate(jnp.where(keep, loss, 0.0))
        # Logical blocks with b >= num_row_blocks (excess steps on the last
        # core, if any) contribute nothing: both accumulates are skipped.


def focal_loss_v1(logits, label, *, block_rows=8192, num_cores=2):
    """Pallas TPU focal loss (alpha=0.25, gamma=2, reduction='mean').

    logits/label: same shape (e.g. NCHW).  Native dtypes are streamed as-is
    (bf16 logits / int8 or f32 labels); the kernel upcasts to f32 in-register.
    """
    assert logits.shape == label.shape
    n_total = math.prod(logits.shape)
    assert n_total > 0
    m = -(-n_total // LANE)                  # rows of 128 lanes
    full_rows, col_rem = divmod(n_total, LANE)

    # Clamp block_rows for small inputs; keep it ROW_ALIGN-aligned so bf16/int8
    # blocks also satisfy the layout divisibility rules.
    block_rows = max(ROW_ALIGN,
                     min(_round_up(block_rows, ROW_ALIGN),
                         _round_up(-(-m // num_cores), ROW_ALIGN)))
    num_row_blocks = -(-m // block_rows)
    # Never run more "cores" than there are row blocks (avoids wasted steps
    # for small/medium inputs; on single-TC chips the axis is serial anyway).
    num_cores = max(1, min(num_cores, num_row_blocks))
    blocks_per_core = -(-num_row_blocks // num_cores)
    total_blocks = num_cores * blocks_per_core

    # Only the sub-128 tail (if any) is padded; row-level raggedness is handled
    # with a partial edge block + in-kernel mask on the last block only.
    flat_logits = logits.reshape(-1)
    flat_label = label.reshape(-1)
    if col_rem:
        pad = LANE - col_rem
        flat_logits = jnp.pad(flat_logits, (0, pad))
        flat_label = jnp.pad(flat_label, (0, pad))
    logits2d = flat_logits.reshape(m, LANE)
    label2d = flat_label.reshape(m, LANE)

    need_tail_mask = (col_rem != 0) or (num_row_blocks * block_rows != m)
    num_full_blocks = num_row_blocks - 1 if need_tail_mask else num_row_blocks
    simple_path = (not need_tail_mask) and (total_blocks == num_row_blocks)

    if total_blocks > num_row_blocks:
        # Clamp the block index so excess steps re-read the last block (their
        # contribution is skipped in-kernel) instead of DMA-ing out of bounds.
        in_map = lambda c, i: (jnp.minimum(c * blocks_per_core + i,
                                           num_row_blocks - 1), 0)
    else:
        in_map = lambda c, i: (c * blocks_per_core + i, 0)

    kernel = functools.partial(
        _focal_loss_kernel,
        blocks_per_core=blocks_per_core,
        block_rows=block_rows,
        num_row_blocks=num_row_blocks,
        num_full_blocks=num_full_blocks,
        need_tail_mask=need_tail_mask,
        simple_path=simple_path,
        full_rows=full_rows,
        col_rem=col_rem,
    )

    bytes_accessed = (logits2d.size * logits2d.dtype.itemsize
                      + label2d.size * label2d.dtype.itemsize
                      + num_cores * SUBLANE * LANE * 4)

    partials = pl.pallas_call(
        kernel,
        out_shape=jax.ShapeDtypeStruct((num_cores * SUBLANE, LANE), jnp.float32),
        grid_spec=pltpu.PrefetchScalarGridSpec(
            num_scalar_prefetch=0,
            grid=(num_cores, blocks_per_core),
            in_specs=[
                pl.BlockSpec((block_rows, LANE), in_map),
                pl.BlockSpec((block_rows, LANE), in_map),
            ],
            out_specs=pl.BlockSpec((SUBLANE, LANE), lambda c, i: (c, 0)),
        ),
        compiler_params=pltpu.CompilerParams(
            # leading axis: independent partial sums (megacore-shardable);
            # trailing axis: sequential reduction with a resident output block.
            dimension_semantics=("parallel", "arbitrary"),
            # 4 MiB f32 tiles * 2 inputs * 2 buffers = 16 MiB; raise the scoped
            # limit so v5e's 16 MiB default doesn't force smaller tiles.
            vmem_limit_bytes=32 * 1024 * 1024,
        ),
        cost_estimate=pl.CostEstimate(
            flops=20 * m * LANE,
            transcendentals=2 * m * LANE,
            bytes_accessed=bytes_accessed,
        ),
    )(logits2d, label2d)

    # reduction='mean': divide by the TRUE (unpadded) element count.
    return jnp.sum(partials) / jnp.float32(n_total)


def focal_loss_ref(logits, label, alpha=ALPHA, gamma=GAMMA):
    """Pure-JAX reference mirroring the PyTorch forward."""
    probs = jax.nn.sigmoid(logits)
    coeff = -jnp.power(jnp.abs(label - probs), gamma)
    log_probs = jnp.where(logits >= 0,
                          -jnp.log1p(jnp.exp(-logits)),
                          logits - jnp.log1p(jnp.exp(logits)))
    log_1_probs = jnp.where(logits >= 0,
                            -logits - jnp.log1p(jnp.exp(-logits)),
                            -jnp.log1p(jnp.exp(logits)))
    loss = label * alpha * log_probs + (1.0 - label) * (1.0 - alpha) * log_1_probs
    return jnp.mean(loss * coeff)


if __name__ == "__main__":
    key = jax.random.PRNGKey(0)
    k1, k2 = jax.random.split(key)

    # NCHW-style inputs: batch=2, channels=4, spatial=16x16 (2048 elements).
    x_shape = (2, 4, 16, 16)
    logits = jax.random.normal(k1, x_shape, dtype=jnp.float32) * 3.0
    label = jax.random.bernoulli(k2, 0.5, x_shape).astype(jnp.float32)

    loss = jax.block_until_ready(focal_loss_v1(logits, label))
    ref = jax.block_until_ready(focal_loss_ref(logits, label))
    assert jnp.allclose(loss, ref, rtol=1e-5, atol=1e-6), (loss, ref)

    # Ragged shape: sub-128 tail pad + masked partial edge block.
    y_shape = (2, 3, 33, 17)   # 3366 elements -> not a multiple of 128
    logits2 = jax.random.normal(k1, y_shape, dtype=jnp.float32) * 3.0
    label2 = jax.random.bernoulli(k2, 0.5, y_shape).astype(jnp.float32)
    loss2 = jax.block_until_ready(focal_loss_v1(logits2, label2))
    ref2 = jax.block_until_ready(focal_loss_ref(logits2, label2))
    assert jnp.allclose(loss2, ref2, rtol=1e-5, atol=1e-6), (loss2, ref2)

    # Native-dtype pass-through: bf16 logits + int8 labels (3 B/elem streamed
    # instead of 8 B/elem); the kernel upcasts to f32 internally.
    z_shape = (2, 4, 32, 32)   # 8192 elements, two full row blocks
    logits3 = (jax.random.normal(k1, z_shape, dtype=jnp.float32) * 3.0
               ).astype(jnp.bfloat16)
    label3 = jax.random.bernoulli(k2, 0.5, z_shape).astype(jnp.int8)
    loss3 = jax.block_until_ready(focal_loss_v1(logits3, label3))
    ref3 = jax.block_until_ready(
        focal_loss_ref(logits3.astype(jnp.float32), label3.astype(jnp.float32)))
    assert jnp.allclose(loss3, ref3, rtol=2e-5, atol=1e-5), (loss3, ref3)

    print("KERNEL_OK")
</pallas_src>

<mosaic_0001>
module attributes {stable_mosaic.version = 11 : i64} {
  func.func @_focal_loss_kernel(%arg0: i32, %arg1: i32, %arg2: memref<32x128xf32, #tpu.memory_space<vmem>>, %arg3: memref<32x128xf32, #tpu.memory_space<vmem>>, %arg4: memref<8x128xf32, #tpu.memory_space<vmem>>) attributes {dimension_semantics = [#tpu.dimension_semantics<parallel>, #tpu.dimension_semantics<arbitrary>], iteration_bounds = array<i64: 1, 1>, scalar_prefetch = 0 : i64, scratch_operands = 0 : i64, tpu.core_type = #tpu.core_type<tc>, window_params = [{transform_indices = @transform_0, window_bounds = array<i64: 32, 128>}, {transform_indices = @transform_1, window_bounds = array<i64: 32, 128>}, {transform_indices = @transform_2, window_bounds = array<i64: 8, 128>}]} {
    %c1_i32 = arith.constant 1 : i32
    %0 = arith.muli %arg0, %c1_i32 : i32
    %1 = arith.addi %0, %arg1 : i32
    %c0_i32 = arith.constant 0 : i32
    %2 = arith.cmpi eq, %arg1, %c0_i32 : i32
    %3 = arith.extui %2 : i1 to i32
    %c0_i32_0 = arith.constant 0 : i32
    %4 = arith.cmpi ne, %3, %c0_i32_0 : i32
    scf.if %4 {
      %cst_16 = arith.constant 0.000000e+00 : f32
      %49 = vector.broadcast %cst_16 : f32 to vector<8x128xf32>
      %c0_17 = arith.constant 0 : index
      %c0_18 = arith.constant 0 : index
      %50 = vector.load %arg4[%c0_17, %c0_18] : memref<8x128xf32, #tpu.memory_space<vmem>>, vector<8x128xf32>
      tpu.vector_store %arg4[%c0_17, %c0_18], %49 {strides = array<i32>} : memref<8x128xf32, #tpu.memory_space<vmem>>, vector<8x128xf32>,
    } else {
    }
    %c0 = arith.constant 0 : index
    %c0_1 = arith.constant 0 : index
    %5 = vector.load %arg2[%c0, %c0_1] : memref<32x128xf32, #tpu.memory_space<vmem>>, vector<32x128xf32>
    %c0_2 = arith.constant 0 : index
    %c0_3 = arith.constant 0 : index
    %6 = vector.load %arg3[%c0_2, %c0_3] : memref<32x128xf32, #tpu.memory_space<vmem>>, vector<32x128xf32>
    %7 = math.absf %5 : vector<32x128xf32>
    %cst = arith.constant 0.000000e+00 : f32
    %8 = vector.broadcast %cst : f32 to vector<32x128xf32>
    %9 = arith.subf %8, %7 : vector<32x128xf32>
    %10 = math.exp %9 : vector<32x128xf32>
    %cst_4 = arith.constant 1.000000e+00 : f32
    %11 = vector.broadcast %cst_4 : f32 to vector<32x128xf32>
    %12 = arith.addf %11, %10 : vector<32x128xf32>
    %13 = tpu.reciprocal %12 {approx = true} : vector<32x128xf32> -> vector<32x128xf32>
    %14 = arith.mulf %12, %13 : vector<32x128xf32>
    %cst_5 = arith.constant 2.000000e+00 : f32
    %15 = vector.broadcast %cst_5 : f32 to vector<32x128xf32>
    %16 = arith.subf %15, %14 : vector<32x128xf32>
    %17 = arith.mulf %13, %16 : vector<32x128xf32>
    %cst_6 = arith.constant 0.000000e+00 : f32
    %18 = vector.broadcast %cst_6 : f32 to vector<32x128xf32>
    %19 = arith.cmpf oge, %5, %18 : vector<32x128xf32>
    %20 = arith.mulf %10, %17 : vector<32x128xf32>
    %21 = arith.select %19, %17, %20 : vector<32x128xi1>, vector<32x128xf32>
    %22 = math.log1p %10 : vector<32x128xf32>
    %cst_7 = arith.constant 0.000000e+00 : f32
    %23 = vector.broadcast %cst_7 : f32 to vector<32x128xf32>
    %24 = arith.minimumf %5, %23 : vector<32x128xf32>
    %25 = arith.subf %24, %22 : vector<32x128xf32>
    %cst_8 = arith.constant 0.000000e+00 : f32
    %26 = vector.broadcast %cst_8 : f32 to vector<32x128xf32>
    %27 = arith.subf %26, %5 : vector<32x128xf32>
    %cst_9 = arith.constant 0.000000e+00 : f32
    %28 = vector.broadcast %cst_9 : f32 to vector<32x128xf32>
    %29 = arith.minimumf %27, %28 : vector<32x128xf32>
    %30 = arith.subf %29, %22 : vector<32x128xf32>
    %31 = arith.subf %6, %21 : vector<32x128xf32>
    %32 = math.absf %31 : vector<32x128xf32>
    %33 = arith.mulf %32, %32 : vector<32x128xf32>
    %cst_10 = arith.constant 0.000000e+00 : f32
    %34 = vector.broadcast %cst_10 : f32 to vector<32x128xf32>
    %35 = arith.subf %34, %33 : vector<32x128xf32>
    %cst_11 = arith.constant 2.500000e-01 : f32
    %36 = vector.broadcast %cst_11 : f32 to vector<32x128xf32>
    %37 = arith.mulf %6, %36 : vector<32x128xf32>
    %38 = arith.mulf %37, %25 : vector<32x128xf32>
    %cst_12 = arith.constant 1.000000e+00 : f32
    %39 = vector.broadcast %cst_12 : f32 to vector<32x128xf32>
    %40 = arith.subf %39, %6 : vector<32x128xf32>
    %cst_13 = arith.constant 7.500000e-01 : f32
    %41 = vector.broadcast %cst_13 : f32 to vector<32x128xf32>
    %42 = arith.mulf %40, %41 : vector<32x128xf32>
    %43 = arith.mulf %42, %30 : vector<32x128xf32>
    %44 = arith.addf %38, %43 : vector<32x128xf32>
    %45 = arith.mulf %44, %35 : vector<32x128xf32>
    %c0_i32_14 = arith.constant 0 : i32
    %46 = arith.cmpi eq, %1, %c0_i32_14 : i32
    %47 = arith.extui %46 : i1 to i32
    %c0_i32_15 = arith.constant 0 : i32
    %48 = arith.cmpi ne, %47, %c0_i32_15 : i32
    scf.if %48 {
      %49 = tpu.iota {dimensions = array<i32: 0>} : vector<32x128xi32>
      %c0_i32_16 = arith.constant 0 : i32
      %50 = vector.broadcast %c0_i32_16 : i32 to vector<32x128xi32>
      %51 = arith.addi %50, %49 : vector<32x128xi32>
      %52 = tpu.iota {dimensions = array<i32: 1>} : vector<32x128xi32>
      %c16_i32 = arith.constant 16 : i32
      %53 = vector.broadcast %c16_i32 : i32 to vector<32x128xi32>
      %54 = arith.cmpi slt, %51, %53 : vector<32x128xi32>
      %c16_i32_17 = arith.constant 16 : i32
      %55 = vector.broadcast %c16_i32_17 : i32 to vector<32x128xi32>
      %56 = arith.cmpi eq, %51, %55 : vector<32x128xi32>
      %c0_i32_18 = arith.constant 0 : i32
      %57 = vector.broadcast %c0_i32_18 : i32 to vector<32x128xi32>
      %58 = arith.cmpi slt, %52, %57 : vector<32x128xi32>
      %59 = arith.andi %56, %58 : vector<32x128xi1>
      %60 = arith.ori %54, %59 : vector<32x128xi1>
      %cst_19 = arith.constant 0.000000e+00 : f32
      %61 = vector.broadcast %cst_19 : f32 to vector<32x128xf32>
      %62 = arith.select %60, %45, %61 : vector<32x128xi1>, vector<32x128xf32>
      %c0_20 = arith.constant 0 : index
      %c0_21 = arith.constant 0 : index
      %63 = vector.load %arg4[%c0_20, %c0_21] : memref<8x128xf32, #tpu.memory_space<vmem>>, vector<8x128xf32>
      %64 = vector.shape_cast %62 : vector<32x128xf32> to vector<4x8x128xf32>
      %cst_22 = arith.constant dense<0.000000e+00> : vector<8x128xf32>
      %65 = vector.multi_reduction <add>, %64, %cst_22 [0] : vector<4x8x128xf32> to vector<8x128xf32>
      %66 = arith.addf %63, %65 : vector<8x128xf32>
      %c0_23 = arith.constant 0 : index
      %c0_24 = arith.constant 0 : index
      %67 = vector.load %arg4[%c0_23, %c0_24] : memref<8x128xf32, #tpu.memory_space<vmem>>, vector<8x128xf32>
      tpu.vector_store %arg4[%c0_23, %c0_24], %66 {strides = array<i32>} : memref<8x128xf32, #tpu.memory_space<vmem>>, vector<8x128xf32>,
    } else {
    }
    return
  }
  func.func @transform_0(%arg0: i32, %arg1: i32) -> (i32, i32) {
    %c1_i32 = arith.constant 1 : i32
    %0 = arith.muli %arg0, %c1_i32 : i32
    %1 = arith.addi %0, %arg1 : i32
    %c0_i32 = arith.constant 0 : i32
    %c0_i32_0 = arith.constant 0 : i32
    return %1, %c0_i32 : i32, i32
  }
  func.func @transform_1(%arg0: i32, %arg1: i32) -> (i32, i32) {
    %c1_i32 = arith.constant 1 : i32
    %0 = arith.muli %arg0, %c1_i32 : i32
    %1 = arith.addi %0, %arg1 : i32
    %c0_i32 = arith.constant 0 : i32
    %c0_i32_0 = arith.constant 0 : i32
    return %1, %c0_i32 : i32, i32
  }
  func.func @transform_2(%arg0: i32, %arg1: i32) -> (i32, i32) {
    %c0_i32 = arith.constant 0 : i32
    %c0_i32_0 = arith.constant 0 : i32
    return %arg0, %c0_i32 : i32, i32
  }
}

</mosaic_0001>

<bundles_post_ra>
// kernel: tpu_custom_call.1
= control target key start
LH: loop header
LB: loop body
LE: loop exit
PB: predicated region body
PF: predicated region fallthrough
CT: control target
= control target key end

     0   :  { %7 = vsyncpa [#allocation3], 0  ;;  %s442_s0 = inlined_call_operand.hbm [shape: f32[16,128], index: 0, kind: input, shape index: {}]   ;;  %s443_s1 = inlined_call_operand.hbm [shape: f32[16,128], index: 1, kind: input, shape index: {}]   ;;  %s444_s2 = inlined_call_operand.hbm [shape: f32[8,128], index: 2, kind: output, shape index: {}]  }
   0x1   :  { %8 = vsyncpa [#allocation6], 0 }
   0x2   :  { %9 = vsyncpa [#allocation4], 0 }
   0x3   :  { %18 = vsyncadd [#allocation3], 256  ;;  %s370_s9 = smov [#allocation2]   ;;  %s298_s13 = scalar_lea.hbm %s442_s0, 256 }
   0x4   :  { %s23_s10 = sshll.u32 %s370_s9, 4  ;;  %p299_p0 = scmp.ne.s32.totalorder %s442_s0, %s298_s13  ;;  %s24_s10 = int_to_ptr.vmem [resolvable:$true] %s23_s10 }
   0x5   :  { %p302_p1 = scmp.lt.u32.totalorder %s298_s13, %s442_s0 }
   0x7   :  { %p304_p2 = pnand %p302_p1, %p299_p0 }
   0x9   :  { %307 = shalt.err (!%p304_p2)
}
   0xa   :  { %s308_s18 = scalar_lea.vmem %s24_s10, 256  ;;  %s312_s19 = scalar_lea.vmem %s24_s10, 512 }
   0xb   :  { %p309_p3 = scmp.ne.s32.totalorder %s24_s10, %s308_s18  ;;  %p313_p4 = scmp.lt.s32.totalorder %s24_s10, %s24_s10 }
   0xc   :  { %p314_p5 = scmp.lt.s32.totalorder %s312_s19, %s308_s18 }
   0xe   :  { %p315_p6 = por %p314_p5, %p313_p4 }
  0x10   :  { %p316_p7 = pnand %p315_p6, %p309_p3 }
  0x12   :  { %319 = shalt.err (!%p316_p7)
}
  0x13   :  { %s371_s20 = smov 128   ;;  %s372_s21 = smov 8  }
  0x14   :  { %29 = dma.hbm_to_vmem [thread:$0]  %s442_s0, 256, %s24_s10, [#allocation3], %s371_s20, %s371_s20, %s372_s21  }
  0x15   :  { %38 = vsyncadd [#allocation6], 256  ;;  %s373_s24 = smov [#allocation5]   ;;  %s320_s28 = scalar_lea.hbm %s443_s1, 256 }
  0x16   :  { %s43_s25 = sshll.u32 %s373_s24, 4  ;;  %p321_p8 = scmp.ne.s32.totalorder %s443_s1, %s320_s28  ;;  %s44_s25 = int_to_ptr.vmem [resolvable:$true] %s43_s25 }
  0x17   :  { %p324_p9 = scmp.lt.u32.totalorder %s320_s28, %s443_s1 }
  0x19   :  { %p326_p10 = pnand %p324_p9, %p321_p8 }
  0x1b   :  { %329 = shalt.err (!%p326_p10)
}
  0x1c   :  { %s330_s5 = scalar_lea.vmem %s44_s25, 256  ;;  %s334_s0 = scalar_lea.vmem %s44_s25, 512 }
  0x1d   :  { %p331_p11 = scmp.ne.s32.totalorder %s44_s25, %s330_s5  ;;  %p335_p12 = scmp.lt.s32.totalorder %s44_s25, %s44_s25 }
  0x1e   :  { %p336_p13 = scmp.lt.s32.totalorder %s334_s0, %s330_s5 }
  0x20   :  { %p337_p0 = por %p336_p13, %p335_p12 }
  0x22   :  { %p338_p1 = pnand %p337_p0, %p331_p11 }
  0x24   :  { %341 = shalt.err (!%p338_p1)
}
  0x25   :  { %49 = dma.hbm_to_vmem [thread:$0]  %s443_s1, 256, %s44_s25, [#allocation6], %s371_s20, %s371_s20, %s372_s21  }
  0x26   :  { %364 = dma.done.wait [#allocation3], 512  }
  0x27   :  { %365 = vsyncadd [#allocation3], 4294966784 }
  0x28   :  { %366 = dma.done.wait [#allocation6], 512  }
  0x29   :  { %367 = vsyncadd [#allocation6], 4294966784  ;;  %v414_v0 = vld [vmem:[#allocation2] sm:$0xff]  ;;  %v416_v1 = vld [vmem:[#allocation2 + $0x8] sm:$0xff]  ;;  %s374_s1 = smov [#allocation7]  }
  0x2a   :  { %v78_v2 = vand.u32 2147483647, %v414_v0  ;;  %v79_v3 = vand.u32 2147483647, %v416_v1  ;;  %v170_v15 = vsub.f32 0.0, %v414_v0  ;;  %v74_v16 = vld [vmem:[#allocation5] sm:$0xff] }
  0x2b   :  { %v75_v19 = vld [vmem:[#allocation5 + $0x8] sm:$0xff]  ;;  %v171_v21 = vsub.f32 0.0, %v416_v1  ;;  %vm114_vm0 = vcmp.ge.f32.partialorder %v414_v0, 0.0  ;;  %v162_v23 = vmin.f32 %v414_v0, 0.0  ;;  %v163_v24 = vmin.f32 %v416_v1, 0.0  ;;  %s270_s8 = sshll.u32 %s374_s1, 4  ;;  %s271_s8 = int_to_ptr.vmem [resolvable:$true] %s270_s8 }
  0x2c   :  { %v82_v4 = vsub.f32 0.0, %v78_v2  ;;  %v83_v5 = vsub.f32 0.0, %v79_v3  ;;  %v174_v28 = vmin.f32 %v170_v15, 0.0  ;;  %v206_v29 = vsub.f32 1.0, %v74_v16  ;;  %s342_s9 = scalar_lea.vmem %s271_s8, 128  ;;  %p347_p3 = scmp.lt.s32.totalorder %s271_s8, %s271_s8 }
  0x2d   :  { %v207_v33 = vsub.f32 1.0, %v75_v19  ;;  %v175_v37 = vmin.f32 %v171_v21, 0.0  ;;  %vm115_vm3 = vcmp.ge.f32.partialorder %v416_v1, 0.0  ;;  %v198_v40 = vmul.f32 0.25, %v74_v16  ;;  %p343_p2 = scmp.ne.s32.totalorder %s271_s8, %s342_s9  ;;  %p348_p4 = scmp.lt.s32.totalorder %s342_s9, %s342_s9 }
  0x2e   :  { %v86_v6 = vmul.f32 1.442695, %v82_v4  ;;  %v88_v7 = vmul.f32 1.442695, %v83_v5  ;;  %v199_v43 = vmul.f32 0.25, %v75_v19  ;;  %v210_v44 = vmul.f32 0.75, %v206_v29 }
  0x2f   :  { %v211_v52 = vmul.f32 0.75, %v207_v33  ;;  %p349_p5 = por %p348_p4, %p347_p3 }
  0x30   :  { %286 = vpow2.f32 %v86_v6 }
  0x31   :  { %288 = vpow2.f32 %v88_v7  ;;  %p350_p6 = pnand %p349_p5, %p343_p2 }
  0x3a   :  { %v287_v8 = vpop.eup %286 }
  0x3b   :  { %v289_v9 = vpop.eup %288  ;;  %v94_v10 = vadd.f32 1.0, %v287_v8  ;;  %v129_v12 = vmul.f32 -0.5, %v287_v8  ;;  %v132_v17 = vand.u32 2147483647, %v287_v8 }
  0x3c   :  { %v95_v11 = vadd.f32 1.0, %v289_v9  ;;  %v138_v13 = vmul.f32 -0.5, %v289_v9  ;;  %v141_v20 = vand.u32 2147483647, %v289_v9 }
  0x3d   :  { %290 = vrcp.f32 %v94_v10  ;;  %v130_v14 = vadd.f32 1.0, %v129_v12  ;;  %vm133_vm1 = vcmp.lt.f32.partialorder %v132_v17, 0.0004427343 }
  0x3e   :  { %292 = vrcp.f32 %v95_v11  ;;  %v139_v18 = vadd.f32 1.0, %v138_v13  ;;  %vm142_vm2 = vcmp.lt.f32.partialorder %v141_v20, 0.0004427343 }
  0x3f   :  { %294 = vlog2.f32 %v94_v10  ;;  %v131_v27 = vmul.f32 %v287_v8, %v130_v14 }
  0x40   :  { %296 = vlog2.f32 %v95_v11  ;;  %v140_v32 = vmul.f32 %v289_v9, %v139_v18 }
  0x47   :  { %v291_v22 = vpop.eup %290 }
  0x48   :  { %v293_v25 = vpop.eup %292  ;;  %v102_v26 = vmul.f32 %v291_v22, %v94_v10 }
  0x49   :  { %v295_v30 = vpop.eup %294  ;;  %v103_v31 = vmul.f32 %v293_v25, %v95_v11 }
  0x4a   :  { %v297_v34 = vpop.eup %296  ;;  %v106_v35 = vsub.f32 2.0, %v102_v26  ;;  %v128_v36 = vmul.f32 0.6931472, %v295_v30 }
  0x4b   :  { %v107_v38 = vsub.f32 2.0, %v103_v31  ;;  %v137_v39 = vmul.f32 0.6931472, %v297_v34 }
  0x4c   :  { %v110_v41 = vmul.f32 %v291_v22, %v106_v35  ;;  %v134_v42 = vsel %vm133_vm1, %v131_v27, %v128_v36 }
  0x4d   :  { %v111_v45 = vmul.f32 %v293_v25, %v107_v38  ;;  %v143_v46 = vsel %vm142_vm2, %v140_v32, %v137_v39  ;;  %v166_v47 = vsub.f32 %v162_v23, %v134_v42  ;;  %v178_v48 = vsub.f32 %v174_v28, %v134_v42 }
  0x4e   :  { %v118_v49 = vmul.f32 %v287_v8, %v110_v41  ;;  %v167_v50 = vsub.f32 %v163_v24, %v143_v46  ;;  %v179_v51 = vsub.f32 %v175_v37, %v143_v46 }
  0x4f   :  { %v119_v53 = vmul.f32 %v289_v9, %v111_v45  ;;  %v202_v57 = vmul.f32 %v198_v40, %v166_v47  ;;  %v214_v58 = vmul.f32 %v210_v44, %v178_v48 }
  0x50   :  { %v122_v54 = vsel %vm114_vm0, %v110_v41, %v118_v49  ;;  %v203_v60 = vmul.f32 %v199_v43, %v167_v50  ;;  %v215_v61 = vmul.f32 %v211_v52, %v179_v51 }
  0x51   :  { %v123_v55 = vsel %vm115_vm3, %v111_v45, %v119_v53  ;;  %v182_v56 = vsub.f32 %v74_v16, %v122_v54  ;;  %v218_v3 = vadd.f32 %v214_v58, %v202_v57 }
  0x52   :  { %v183_v59 = vsub.f32 %v75_v19, %v123_v55  ;;  %v219_v5 = vadd.f32 %v215_v61, %v203_v60 }
  0x53   :  { %v186_v62 = vand.u32 2147483647, %v182_v56 }
  0x54   :  { %v187_v63 = vand.u32 2147483647, %v183_v59 }
  0x55   :  { %v190_v2 = vmul.f32 %v186_v62, %v186_v62 }
  0x56   :  { %v191_v4 = vmul.f32 %v187_v63, %v187_v63 }
  0x57   :  { %v194_v6 = vsub.f32 0.0, %v190_v2 }
  0x58   :  { %v195_v7 = vsub.f32 0.0, %v191_v4 }
  0x59   :  { %v222_v8 = vmul.f32 %v218_v3, %v194_v6 }
  0x5a   :  { %v223_v0 = vmul.f32 %v219_v5, %v195_v7 }
  0x5c   :  { %v259_v1 = vadd.f32 %v223_v0, %v222_v8 }
  0x5e   :  { %263 = vst [vmem:[#allocation7] sm:$0xff] %v259_v1 }
  0x5f   :  { %353 = shalt.err (!%p350_p6)
}
  0x60   :  { %s354_s12 = scalar_lea.hbm %s444_s2, 128 }
  0x61   :  { %p355_p7 = scmp.ne.s32.totalorder %s444_s2, %s354_s12  ;;  %p358_p8 = scmp.lt.u32.totalorder %s354_s12, %s444_s2 }
  0x63   :  { %p360_p9 = pnand %p358_p8, %p355_p7 }
  0x65   :  { %363 = shalt.err (!%p360_p9)
}
  0x66   :  { %273 = dma.vmem_to_hbm [thread:$0]  %s271_s8, 128, %s444_s2, [#allocation4]  }
  0x67   :  { %368 = dma.done.wait [#allocation4], 128  }
  0x68   :  { %369 = vsyncadd [#allocation4], 4294967168 }
  0x69   :  { %277 = vsyncpa [#allocation3], 1 }
  0x6a   :  { %278 = vsyncpa [#allocation6], 1 }
  0x6b   :  { %279 = vsyncpa [#allocation4], 1 }

</bundles_post_ra>
